<compile_context>
chip_gen: v7x
topology: tpu7x:2x2x1
jax: 0.10.0
libtpu: 0.0.40
codegen_flags: <defaults>
</compile_context>

<pallas_src>
import functools

import jax
import jax.numpy as jnp
from jax.experimental import pallas as pl
from jax.experimental.pallas import tpu as pltpu

_LANE = 128


def _round_up(n, m):
    return pl.cdiv(n, m) * m


def _policy_kernel(xT_ref, w1_ref, b1_ref, w2_ref, b2_ref, oT_ref):
    # fc1 + ReLU:   h^T = relu(W1 @ x^T + b1)            [h1, TB]
    h = jnp.dot(w1_ref[...], xT_ref[...], preferred_element_type=jnp.float32)
    h = jnp.maximum(h + b1_ref[...], 0.0)

    # out layer:    logits^T = W2 @ h^T + b2             [out_actions, TB]
    logits = jnp.dot(w2_ref[...], h.astype(w2_ref.dtype),
                     preferred_element_type=jnp.float32)
    logits = logits + b2_ref[...]

    # numerically-stable softmax over the action (sublane) axis.
    # Exact division (not approx reciprocal) so each column sums to 1 to f32
    # rounding -- this was the source of the previous sum-to-1 failure.
    m = jnp.max(logits, axis=0, keepdims=True)             # [1, TB]
    e = jnp.exp(logits - m)                                 # [out, TB]
    denom = jnp.sum(e, axis=0, keepdims=True)               # [1, TB]
    oT_ref[...] = (e / denom).astype(oT_ref.dtype)


def _choose_batch_tile(batch, block_b):
    """Batch tile (lane axis). One full-dim block for tiny batches; otherwise a
    multiple of 128 giving >=2 grid steps so v7x megacore splits the work."""
    if batch <= _LANE:
        return batch
    tb = min(block_b, _round_up(pl.cdiv(batch, 2), _LANE))
    return max(tb, _LANE)


@functools.partial(jax.jit,
                   static_argnames=("block_b", "compute_dtype", "out_dtype"))
def policy_forward_t(xT, w1, b1, w2, b2, *, block_b=4096,
                     compute_dtype=None, out_dtype=jnp.float32):
    """Feature-major forward: xT [in_states, B] -> probsT [out_actions, B].

    Weights/biases use the native PyTorch layouts (w1: [h1, in], b1: [h1],
    w2: [out, h1], b2: [out]); nothing is padded or copied wrapper-side.
    compute_dtype=jnp.bfloat16 streams x/W1/W2 in bf16 with f32 accumulation.
    """
    in_states, batch = xT.shape
    h1 = w1.shape[0]
    out_actions = w2.shape[0]

    if compute_dtype is not None:
        xT = xT.astype(compute_dtype)
        w1 = w1.astype(compute_dtype)
        w2 = w2.astype(compute_dtype)
    b1c = b1.reshape(h1, 1).astype(jnp.float32)             # lane-broadcast bias
    b2c = b2.reshape(out_actions, 1).astype(jnp.float32)

    tb = _choose_batch_tile(batch, block_b)
    grid = (pl.cdiv(batch, tb),)   # ragged tail -> Mosaic partial last block

    itemsize = lambda a: a.size * a.dtype.itemsize
    cost = pl.CostEstimate(
        flops=2 * batch * (in_states * h1 + h1 * out_actions),
        transcendentals=batch * out_actions,                 # exp
        bytes_accessed=(itemsize(xT) + itemsize(w1) + itemsize(b1c)
                        + itemsize(w2) + itemsize(b2c)
                        + batch * out_actions * jnp.dtype(out_dtype).itemsize),
    )

    return pl.pallas_call(
        _policy_kernel,
        out_shape=jax.ShapeDtypeStruct((out_actions, batch), out_dtype),
        grid_spec=pl.GridSpec(
            grid=grid,
            in_specs=[
                pl.BlockSpec((in_states, tb), lambda i: (0, i)),    # x^T tiles
                pl.BlockSpec((h1, in_states), lambda i: (0, 0)),    # W1 resident
                pl.BlockSpec((h1, 1), lambda i: (0, 0)),            # b1 resident
                pl.BlockSpec((out_actions, h1), lambda i: (0, 0)),  # W2 resident
                pl.BlockSpec((out_actions, 1), lambda i: (0, 0)),   # b2 resident
            ],
            out_specs=pl.BlockSpec((out_actions, tb), lambda i: (0, i)),
        ),
        compiler_params=pltpu.CompilerParams(
            dimension_semantics=("parallel",),   # megacore batch split on v7x
        ),
        cost_estimate=cost,
    )(xT, w1, b1c, w2, b2c)


@functools.partial(jax.jit, static_argnames=("block_b", "compute_dtype"))
def policy_forward(x, w1, b1, w2, b2, *, block_b=4096, compute_dtype=None):
    """Drop-in equivalent of the PyTorch module.

    x: [B, in_states]; w1: [h1, in]; b1: [h1]; w2: [out, h1]; b2: [out]
    (exactly nn.Linear's parameter layout). Returns probabilities [B, out].
    The transposes here are pure layout plumbing; call policy_forward_t
    directly when x is already stored feature-major.
    """
    probsT = policy_forward_t(x.T, w1, b1, w2, b2, block_b=block_b,
                              compute_dtype=compute_dtype, out_dtype=x.dtype)
    return probsT.T


def init_params(key, in_states, h1_nodes, out_actions):
    """nn.Linear default init (uniform +/- 1/sqrt(fan_in)), PyTorch layouts."""
    k1, k2, k3, k4 = jax.random.split(key, 4)
    bound1 = 1.0 / jnp.sqrt(in_states)
    bound2 = 1.0 / jnp.sqrt(h1_nodes)
    w1 = jax.random.uniform(k1, (h1_nodes, in_states), jnp.float32, -bound1, bound1)
    b1 = jax.random.uniform(k2, (h1_nodes,), jnp.float32, -bound1, bound1)
    w2 = jax.random.uniform(k3, (out_actions, h1_nodes), jnp.float32, -bound2, bound2)
    b2 = jax.random.uniform(k4, (out_actions,), jnp.float32, -bound2, bound2)
    return w1, b1, w2, b2


def _ref_forward(x, w1, b1, w2, b2):
    h = jnp.maximum(x @ w1.T + b1, 0.0)
    return jax.nn.softmax(h @ w2.T + b2, axis=-1)


if __name__ == "__main__":
    in_states, h1_nodes, out_actions = 16, 32, 4
    batch = 8

    key = jax.random.PRNGKey(0)
    kx, kp, kx2 = jax.random.split(key, 3)
    x = jax.random.normal(kx, (batch, in_states), jnp.float32)
    w1, b1, w2, b2 = init_params(kp, in_states, h1_nodes, out_actions)

    # small batch: single full-dim block, grid=(1,)
    out = policy_forward(x, w1, b1, w2, b2)
    jax.block_until_ready(out)
    ref = _ref_forward(x, w1, b1, w2, b2)
    assert out.shape == (batch, out_actions)
    assert jnp.allclose(out, ref, atol=2e-3, rtol=2e-3)
    assert jnp.allclose(jnp.sum(out, axis=-1), 1.0, atol=1e-4)

    # larger, non-aligned batch: batch tiling (grid=(2,)) + ragged last block
    x_big = jax.random.normal(kx2, (300, in_states), jnp.float32)
    out_big = policy_forward(x_big, w1, b1, w2, b2)
    jax.block_until_ready(out_big)
    ref_big = _ref_forward(x_big, w1, b1, w2, b2)
    assert out_big.shape == (300, out_actions)
    assert jnp.allclose(out_big, ref_big, atol=2e-3, rtol=2e-3)
    assert jnp.allclose(jnp.sum(out_big, axis=-1), 1.0, atol=1e-4)

    # bf16 input/weight path (recommended on v5e/v6e/v7x): f32 accumulation,
    # looser tolerance vs the f32 reference; normalization is still exact.
    out_bf16 = policy_forward(x_big, w1, b1, w2, b2, compute_dtype=jnp.bfloat16)
    jax.block_until_ready(out_bf16)
    assert jnp.allclose(out_bf16, ref_big, atol=2e-2, rtol=2e-2)
    assert jnp.allclose(jnp.sum(out_bf16, axis=-1), 1.0, atol=1e-4)

    print("KERNEL_OK")
</pallas_src>

<mosaic_0001>
module attributes {stable_mosaic.version = 11 : i64} {
  func.func @_policy_kernel(%arg0: i32, %arg1: memref<16x8xf32, #tpu.memory_space<vmem>>, %arg2: memref<32x16xf32, #tpu.memory_space<vmem>>, %arg3: memref<32x1xf32, #tpu.memory_space<vmem>>, %arg4: memref<4x32xf32, #tpu.memory_space<vmem>>, %arg5: memref<4x1xf32, #tpu.memory_space<vmem>>, %arg6: memref<4x8xf32, #tpu.memory_space<vmem>>) attributes {dimension_semantics = [#tpu.dimension_semantics<parallel>], iteration_bounds = array<i64: 1>, scalar_prefetch = 0 : i64, scratch_operands = 0 : i64, tpu.core_type = #tpu.core_type<tc>, window_params = [{transform_indices = @transform_0, window_bounds = array<i64: 16, 8>}, {pipeline_mode = #tpu.pipeline_mode<synchronous>, transform_indices = @transform_1, window_bounds = array<i64: 32, 16>}, {pipeline_mode = #tpu.pipeline_mode<synchronous>, transform_indices = @transform_2, window_bounds = array<i64: 32, 1>}, {pipeline_mode = #tpu.pipeline_mode<synchronous>, transform_indices = @transform_3, window_bounds = array<i64: 4, 32>}, {pipeline_mode = #tpu.pipeline_mode<synchronous>, transform_indices = @transform_4, window_bounds = array<i64: 4, 1>}, {transform_indices = @transform_5, window_bounds = array<i64: 4, 8>}]} {
    %c0 = arith.constant 0 : index
    %c0_0 = arith.constant 0 : index
    %0 = vector.load %arg2[%c0, %c0_0] : memref<32x16xf32, #tpu.memory_space<vmem>>, vector<32x16xf32>
    %c0_1 = arith.constant 0 : index
    %c0_2 = arith.constant 0 : index
    %1 = vector.load %arg1[%c0_1, %c0_2] : memref<16x8xf32, #tpu.memory_space<vmem>>, vector<16x8xf32>
    %cst = arith.constant dense<0.000000e+00> : vector<32x8xf32>
    %2 = tpu.matmul %0, %1, %cst {dimension_numbers = #tpu.dot_dimension_numbers<[1], [0], [0], [1], [0, 0, 1, 1], [], []>} : vector<32x16xf32>, vector<16x8xf32>, vector<32x8xf32> -> vector<32x8xf32>
    %c0_3 = arith.constant 0 : index
    %c0_4 = arith.constant 0 : index
    %3 = vector.load %arg3[%c0_3, %c0_4] : memref<32x1xf32, #tpu.memory_space<vmem>>, vector<32x1xf32>
    %4 = vector.broadcast %3 : vector<32x1xf32> to vector<32x8xf32>
    %5 = arith.addf %2, %4 : vector<32x8xf32>
    %cst_5 = arith.constant 0.000000e+00 : f32
    %6 = vector.broadcast %cst_5 : f32 to vector<32x8xf32>
    %7 = arith.maximumf %5, %6 : vector<32x8xf32>
    %c0_6 = arith.constant 0 : index
    %c0_7 = arith.constant 0 : index
    %8 = vector.load %arg4[%c0_6, %c0_7] : memref<4x32xf32, #tpu.memory_space<vmem>>, vector<4x32xf32>
    %cst_8 = arith.constant dense<0.000000e+00> : vector<4x8xf32>
    %9 = tpu.matmul %8, %7, %cst_8 {dimension_numbers = #tpu.dot_dimension_numbers<[1], [0], [0], [1], [0, 0, 1, 1], [], []>} : vector<4x32xf32>, vector<32x8xf32>, vector<4x8xf32> -> vector<4x8xf32>
    %c0_9 = arith.constant 0 : index
    %c0_10 = arith.constant 0 : index
    %10 = vector.load %arg5[%c0_9, %c0_10] : memref<4x1xf32, #tpu.memory_space<vmem>>, vector<4x1xf32>
    %11 = vector.broadcast %10 : vector<4x1xf32> to vector<4x8xf32>
    %12 = arith.addf %9, %11 : vector<4x8xf32>
    %cst_11 = arith.constant dense<0xFF800000> : vector<8xf32>
    %13 = vector.multi_reduction <maximumf>, %12, %cst_11 [0] : vector<4x8xf32> to vector<8xf32>
    %14 = vector.shape_cast %13 : vector<8xf32> to vector<1x8xf32>
    %15 = vector.broadcast %14 : vector<1x8xf32> to vector<4x8xf32>
    %16 = arith.subf %12, %15 : vector<4x8xf32>
    %17 = math.exp %16 : vector<4x8xf32>
    %cst_12 = arith.constant dense<0.000000e+00> : vector<8xf32>
    %18 = vector.multi_reduction <add>, %17, %cst_12 [0] : vector<4x8xf32> to vector<8xf32>
    %19 = vector.shape_cast %18 : vector<8xf32> to vector<1x8xf32>
    %20 = vector.broadcast %19 : vector<1x8xf32> to vector<4x8xf32>
    %21 = arith.divf %17, %20 : vector<4x8xf32>
    %c0_13 = arith.constant 0 : index
    %c0_14 = arith.constant 0 : index
    %22 = vector.load %arg6[%c0_13, %c0_14] : memref<4x8xf32, #tpu.memory_space<vmem>>, vector<4x8xf32>
    tpu.vector_store %arg6[%c0_13, %c0_14], %21 {strides = array<i32>} : memref<4x8xf32, #tpu.memory_space<vmem>>, vector<4x8xf32>,
    return
  }
  func.func @transform_0(%arg0: i32) -> (i32, i32) {
    %c0_i32 = arith.constant 0 : i32
    %c0_i32_0 = arith.constant 0 : i32
    return %c0_i32, %arg0 : i32, i32
  }
  func.func @transform_1(%arg0: i32) -> (i32, i32) {
    %c0_i32 = arith.constant 0 : i32
    %c0_i32_0 = arith.constant 0 : i32
    %c0_i32_1 = arith.constant 0 : i32
    return %c0_i32, %c0_i32_0 : i32, i32
  }
  func.func @transform_2(%arg0: i32) -> (i32, i32) {
    %c0_i32 = arith.constant 0 : i32
    %c0_i32_0 = arith.constant 0 : i32
    %c0_i32_1 = arith.constant 0 : i32
    return %c0_i32, %c0_i32_0 : i32, i32
  }
  func.func @transform_3(%arg0: i32) -> (i32, i32) {
    %c0_i32 = arith.constant 0 : i32
    %c0_i32_0 = arith.constant 0 : i32
    %c0_i32_1 = arith.constant 0 : i32
    return %c0_i32, %c0_i32_0 : i32, i32
  }
  func.func @transform_4(%arg0: i32) -> (i32, i32) {
    %c0_i32 = arith.constant 0 : i32
    %c0_i32_0 = arith.constant 0 : i32
    %c0_i32_1 = arith.constant 0 : i32
    return %c0_i32, %c0_i32_0 : i32, i32
  }
  func.func @transform_5(%arg0: i32) -> (i32, i32) {
    %c0_i32 = arith.constant 0 : i32
    %c0_i32_0 = arith.constant 0 : i32
    return %c0_i32, %arg0 : i32, i32
  }
}

</mosaic_0001>

<bundles_post_ra>
// kernel: policy_forward_t.1
= control target key start
LH: loop header
LB: loop body
LE: loop exit
PB: predicated region body
PF: predicated region fallthrough
CT: control target
= control target key end

     0   :  { %vm51_vm0 = vcmask 130048   ;;  %v351_v4 = vmov 0   ;;  %s441_s0 = inlined_call_operand.vmem [shape: f32[16,8], index: 0, kind: input, shape index: {}]   ;;  %s442_s1 = inlined_call_operand.vmem [shape: f32[32,16], index: 1, kind: input, shape index: {}]   ;;  %s443_s2 = inlined_call_operand.vmem [shape: f32[32,1], index: 2, kind: input, shape index: {}]   ;;  %s444_s3 = inlined_call_operand.vmem [shape: f32[4,32], index: 3, kind: input, shape index: {}]   ;;  %s445_s4 = inlined_call_operand.vmem [shape: f32[4,1], index: 4, kind: input, shape index: {}]   ;;  %s446_s5 = inlined_call_operand.hbm [shape: f32[4,8], index: 5, kind: output, shape index: {}]  }
   0x1   :  { %v25_v0 = vld [vmem:[%s441_s0] sm:$0xff]  ;;  %v26_v1 = vld [vmem:[%s441_s0 + $0x8] sm:$0xff]  ;;  %321 = vset.pattern.permute.xlu0 %v351_v4  ;;  %322 = vset.pattern.permute.xlu1 %v351_v4  ;;  %v29_v6 = vld [vmem:[%s443_s2 + $0x10] sm:$0xff] }
   0x2   :  { %v21_v2 = vld [vmem:[%s442_s1] sm:$0xff]  ;;  %v306_v3 = vpack.c.bf16 %v26_v1, %v25_v0 }
   0x3   :  { %289 = vmatprep.mubr.msk.f32.mxu0 %vm51_vm0, %v21_v2  ;;  %v27_v5 = vld [vmem:[%s443_s2] sm:$0xff] }
   0x4   :  { %307 = vmatprep.subr.bf16.mxu0 %v306_v3  ;;  %33 = vperm.xlu0 %321, %v27_v5  }
   0x5   :  { %10 = vsyncpa [#allocation3], 0  ;;  %309 = vmatpush3.bf16.msra.mxu0 %v306_v3  ;;  %v22_v7 = vld [vmem:[%s442_s1 + $0x8] sm:$0xff]  ;;  %43 = vperm.xlu1 %322, %v29_v6   ;;  %v23_v9 = vld [vmem:[%s442_s1 + $0x10] sm:$0xff]  ;;  %v352_v13 = vmov 0.0|0.0   ;;  %vm353_vm1 = vmmov 0  }
   0x6   :  { %v28_v8 = vld [vmem:[%s443_s2 + $0x8] sm:$0xff]  ;;  %v30_v10 = vld [vmem:[%s443_s2 + $0x18] sm:$0xff]  ;;  %v154_v12 = vld [vmem:[%s445_s4] sm:$0xf]  ;;  %310 = vmatprep.subr.bf16.mxu1 %v352_v13  ;;  %v354_v14 = vmov 0.0   ;;  %vm160_vm2 = vcmask 261120  }
   0x7   :  { %v24_v11 = vld [vmem:[%s442_s1 + $0x18] sm:$0xff]  ;;  %303 = vmatprep.mubr.msk.f32.mxu1 %vm353_vm1, %v354_v14  ;;  %v153_v33 = vld [vmem:[%s444_s3] sm:$0xf]  ;;  %vm234_vm3 = vcmask 60416   ;;  %s355_s3 = smov [#allocation2]  }
   0x8   :  { %290 = vmatmul.mubr.msk.f32.vlgmr.msra.gmra.mrb[0].mxu0 %vm51_vm0, %v22_v7  ;;  %38 = vperm.xlu0 %321, %v28_v8   ;;  %s261_s4 = sshll.u32 %s355_s3, 4  ;;  %s262_s4 = int_to_ptr.vmem [resolvable:$true] %s261_s4 }
   0x9   :  { %292 = vmatprep.mubr.msk.f32.mxu0 %vm51_vm0, %v23_v9  ;;  %48 = vperm.xlu1 %322, %v30_v10   ;;  %s327_s14 = scalar_lea.vmem %s262_s4, 64  ;;  %p332_p1 = scmp.lt.s32.totalorder %s262_s4, %s262_s4 }
   0xa   :  { %p328_p0 = scmp.ne.s32.totalorder %s262_s4, %s327_s14  ;;  %p333_p2 = scmp.lt.s32.totalorder %s327_s14, %s327_s14 }
   0xc   :  { %293 = vmatmul.mubr.msk.f32.gmra.mrb[2].mxu0 %vm51_vm0, %v24_v11  ;;  %157 = vperm.xlu0 %321, %v154_v12   ;;  %p334_p3 = por %p333_p2, %p332_p1 }
   0xe   :  { %p335_p4 = pnand %p334_p3, %p328_p0 }
  0x83   :  { %v34_v15 = vpop.permute.xlu0 %33 }
  0x84   :  { %v44_v16 = vpop.permute.xlu1 %43 }
  0x87   :  { %v39_v17 = vpop.permute.xlu0 %38 }
  0x88   :  { %v49_v23 = vpop.permute.xlu1 %48 }
  0x8b   :  { %v158_v34 = vpop.permute.xlu0 %157 }
  0xdb   :  { %v291_v18 = vpop.f32.mrb[0].mxu0 }
  0xdc   :  { %v136_v19 = vadd.f32 %v291_v18, %v39_v17  ;;  %v130_v20 = vpop.f32.mrb[1].mxu0 }
  0xdd   :  { %v131_v21 = vadd.f32 %v130_v20, %v34_v15 }
  0xde   :  { %v150_v22 = vmax.f32 %v136_v19, 0.0 }
  0xdf   :  { %v149_v24 = vmax.f32 %v131_v21, 0.0  ;;  %v294_v25 = vpop.f32.mrb[2].mxu0 }
  0xe0   :  { %v146_v26 = vadd.f32 %v294_v25, %v49_v23  ;;  %v140_v27 = vpop.f32.mrb[3].mxu0 }
  0xe1   :  { %v141_v28 = vadd.f32 %v140_v27, %v44_v16  ;;  %v311_v29 = vpack.c.bf16 %v150_v22, %v149_v24 }
  0xe2   :  { %v152_v30 = vmax.f32 %v146_v26, 0.0 }
  0xe3   :  { %v151_v31 = vmax.f32 %v141_v28, 0.0  ;;  %312 = vmatpush3.bf16.msra.mxu1 %v311_v29 }
  0xe4   :  { %313 = vmatprep.subr.bf16.mxu1 %v352_v13 }
  0xe5   :  { %v314_v32 = vpack.c.bf16 %v152_v30, %v151_v31 }
  0xe7   :  { %315 = vmatpush3.bf16.msra.mxu1 %v314_v32 }
  0xea   :  { %304 = vmatmul.mubr.msk.f32.vlgmr.msra.gmra.mrb[0].mxu1 %vm160_vm2, %v153_v33 }
 0x1bd   :  { %v230_v35 = vpop.f32.mrb[0].mxu1 }
 0x1be   :  { %v231_v36 = vadd.f32 %v230_v35, %v158_v34  ;;  %v305_v37 = vpop.f32.mrb[1].mxu1 }
 0x1c0   :  { %v235_v38 = vsel %vm234_vm3, %v231_v36, -inf }
 0x1c1   :  { %v236_v39 = vrot.slane %v235_v38, 4 }
 0x1c3   :  { %v237_v40 = vmax.f32 %v235_v38, %v236_v39 }
 0x1c5   :  { %v238_v41 = vrot.slane %v237_v40, 2 }
 0x1c7   :  { %v239_v42 = vmax.f32 %v237_v40, %v238_v41 }
 0x1c9   :  { %v240_v43 = vrot.slane %v239_v42, 1 }
 0x1cb   :  { %v241_v44 = vmax.f32 %v239_v42, %v240_v43 }
 0x1cd   :  { %v242_v45 = vsub.f32 %v231_v36, %v241_v44 }
 0x1cf   :  { %v243_v46 = vmul.f32 1.442695, %v242_v45 }
 0x1d1   :  { %323 = vpow2.f32 %v243_v46 }
 0x1db   :  { %v324_v47 = vpop.eup %323 }
 0x1dc   :  { %v245_v48 = vsel %vm234_vm3, %v324_v47, 0.0 }
 0x1dd   :  { %v246_v49 = vrot.slane %v245_v48, 4 }
 0x1df   :  { %v247_v50 = vadd.f32 %v246_v49, %v245_v48 }
 0x1e1   :  { %v248_v51 = vrot.slane %v247_v50, 2 }
 0x1e3   :  { %v249_v52 = vadd.f32 %v248_v51, %v247_v50 }
 0x1e5   :  { %v250_v53 = vrot.slane %v249_v52, 1 }
 0x1e7   :  { %v251_v54 = vadd.f32 %v250_v53, %v249_v52 }
 0x1e9   :  { %325 = vrcp.f32 %v251_v54 }
 0x1f3   :  { %v326_v55 = vpop.eup %325 }
 0x1f4   :  { %v253_v56 = vmul.f32 %v326_v55, %v324_v47 }
 0x1f6   :  { %254 = vst.msk [vmem:[#allocation2] sm:$0xf] %vm234_vm3, %v253_v56 }
 0x1f7   :  { %338 = shalt.err (!%p335_p4)
}
 0x1f8   :  { %s339_s17 = scalar_lea.hbm %s446_s5, 64 }
 0x1f9   :  { %p340_p5 = scmp.ne.s32.totalorder %s446_s5, %s339_s17  ;;  %p343_p6 = scmp.lt.u32.totalorder %s339_s17, %s446_s5 }
 0x1fb   :  { %p345_p7 = pnand %p343_p6, %p340_p5 }
 0x1fd   :  { %348 = shalt.err (!%p345_p7)
}
 0x1fe   :  { %264 = dma.vmem_to_hbm [thread:$0]  %s262_s4, 64, %s446_s5, [#allocation3]  }
 0x1ff   :  { %349 = dma.done.wait [#allocation3], 64  }
 0x200   :  { %350 = vsyncadd [#allocation3], 4294967232 }
 0x201   :  { %268 = vsyncpa [#allocation3], 1 }

</bundles_post_ra>
